<compile_context>
chip_gen: v7x
topology: tpu7x:2x2x1
jax: 0.10.0
libtpu: 0.0.40
codegen_flags: <defaults>
</compile_context>

<pallas_src>
import functools

import jax
import jax.numpy as jnp
from jax.experimental import pallas as pl
from jax.experimental.pallas import tpu as pltpu


def _round_up(x, m):
    return (x + m - 1) // m * m


def _cdiv(a, b):
    return (a + b - 1) // b


def _vmem_budget_bytes():
    """Half of physical VMEM; conservative fallback if the query fails."""
    try:
        cap = int(pltpu.get_tpu_info().vmem_capacity_bytes)
        if cap > 0:
            return cap // 2
    except Exception:
        pass
    return 32 * 1024 * 1024


def _predict_kernel(u_ref, i_ref, w_ref, b_ref, o_ref, *, compute_dtype):
    E = o_ref.shape[-1]
    u = u_ref[...]
    i = i_ref[...]
    if compute_dtype is not None:
        # In-kernel cast: VPU work hidden under DMA; keeps wrapper-side HBM
        # traffic at the original dtype while cutting MXU passes.
        u = u.astype(compute_dtype)
        i = i.astype(compute_dtype)
    elem = u * i  # torch.mul(u_emb, i_emb)

    # concat + Linear fused as three MXU matmuls against static slices of the
    # VMEM-resident (3E, E) weight, accumulated in f32.
    acc = jnp.dot(elem, w_ref[0 * E:1 * E, :], preferred_element_type=jnp.float32)
    acc = acc + jnp.dot(u, w_ref[1 * E:2 * E, :], preferred_element_type=jnp.float32)
    acc = acc + jnp.dot(i, w_ref[2 * E:3 * E, :], preferred_element_type=jnp.float32)
    acc = acc + b_ref[...]  # (1, E) f32 bias broadcasts over the batch tile

    # ReLU; Dropout is identity in eval mode.
    # TODO(synk): training-mode dropout would need pltpu.prng_seed + prng_random_bits.
    o_ref[...] = jnp.maximum(acc, 0.0).astype(o_ref.dtype)


def predict_layer(u_emb, i_emb, weight, bias, *, block_b=2048,
                  compute_dtype=None, out_dtype=None):
    """NCF PredictLayer forward (eval mode).

    weight: (E, 3E) PyTorch nn.Linear layout; bias: (E,).
    compute_dtype: optional matmul-operand dtype (e.g. jnp.bfloat16), applied
                   in-kernel; accumulation stays f32.  Recommended on v5e.
    out_dtype: optional output dtype (default: u_emb.dtype).
    """
    B, E = u_emb.shape
    out_dtype = u_emb.dtype if out_dtype is None else jnp.dtype(out_dtype)

    wt = weight.T  # (3E, E): rows [0:E) hit elem, [E:2E) hit u, [2E:3E) hit i
    b2d = bias.reshape(1, E).astype(jnp.float32)
    if compute_dtype is not None:
        wt = wt.astype(compute_dtype)  # tiny & reused: wrapper-side cast is fine

    u_bytes = jnp.dtype(u_emb.dtype).itemsize
    i_bytes = jnp.dtype(i_emb.dtype).itemsize
    o_bytes = out_dtype.itemsize
    w_bytes = 3 * E * E * jnp.dtype(wt.dtype).itemsize

    # Single-buffer the resident weight/bias when they are large enough to matter.
    single_buffer_weight = w_bytes > (4 << 20)
    weight_bufs = 1 if single_buffer_weight else 2
    weight_vmem = weight_bufs * (w_bytes + _round_up(E * 4, 1024))

    # ---- Batch-tile selection ------------------------------------------------
    budget = _vmem_budget_bytes()
    per_row_vmem = 2 * E * (u_bytes + i_bytes + o_bytes)  # double-buffered u,i,out
    tb_cap = max(16, ((budget - weight_vmem) // max(per_row_vmem, 1)) // 16 * 16)
    tb = min(_round_up(block_b, 16), tb_cap)
    if B > 16:
        # Keep the grid >= 2 (balanced) steps so v7x's two TensorCores both run.
        tb = min(tb, _round_up(_cdiv(B, 2), 16))
    if tb >= B:
        tb = B  # single block == full array: legal for any B / dtype
    grid = (_cdiv(B, tb),)

    compiler_kwargs = dict(dimension_semantics=("parallel",))
    est_vmem = weight_vmem + tb * per_row_vmem + (1 << 20)
    if est_vmem > (12 << 20):  # would approach v5e's 16 MiB default scoped VMEM
        compiler_kwargs["vmem_limit_bytes"] = int(min(est_vmem * 3 // 2, 2 * budget))

    resident_kwargs = (
        {"pipeline_mode": pl.Buffered(1)} if single_buffer_weight else {}
    )

    kernel = functools.partial(_predict_kernel, compute_dtype=compute_dtype)

    return pl.pallas_call(
        kernel,
        out_shape=jax.ShapeDtypeStruct((B, E), out_dtype),
        grid=grid,
        in_specs=[
            pl.BlockSpec((tb, E), lambda b: (b, 0)),                        # u tile
            pl.BlockSpec((tb, E), lambda b: (b, 0)),                        # i tile
            pl.BlockSpec((3 * E, E), lambda b: (0, 0), **resident_kwargs),  # weight
            pl.BlockSpec((1, E), lambda b: (0, 0), **resident_kwargs),      # bias
        ],
        out_specs=pl.BlockSpec((tb, E), lambda b: (b, 0)),
        compiler_params=pltpu.CompilerParams(**compiler_kwargs),
    )(u_emb, i_emb, wt, b2d)


def predict_layer_ref(u_emb, i_emb, weight, bias):
    elem = u_emb * i_emb
    new_emb = jnp.concatenate([elem, u_emb, i_emb], axis=1)
    return jnp.maximum(new_emb @ weight.T + bias, 0.0)


if __name__ == "__main__":
    E = 128  # embedding_size
    key = jax.random.PRNGKey(0)
    ku, ki, kw, kb = jax.random.split(key, 4)

    # nn.Linear(embedding_size*3, embedding_size): weight (E, 3E), bias (E,)
    bound = 1.0 / jnp.sqrt(3.0 * E)
    weight = jax.random.uniform(kw, (E, 3 * E), dtype=jnp.float32,
                                minval=-bound, maxval=bound)
    bias = jax.random.uniform(kb, (E,), dtype=jnp.float32,
                              minval=-bound, maxval=bound)

    # --- Test 1: f32 path, single block (block == full array) ----------------
    B = 8
    u_emb = jax.random.normal(ku, (B, E), dtype=jnp.float32)
    i_emb = jax.random.normal(ki, (B, E), dtype=jnp.float32)
    out = jax.block_until_ready(predict_layer(u_emb, i_emb, weight, bias))
    ref = predict_layer_ref(u_emb, i_emb, weight, bias)
    assert out.shape == (B, E) and out.dtype == jnp.float32
    assert jnp.allclose(out, ref, atol=1e-5, rtol=1e-5)

    # --- Test 2: ragged last block (no wrapper-side pad / slice) -------------
    B2 = 20
    u2 = jax.random.normal(jax.random.fold_in(ku, 1), (B2, E), dtype=jnp.float32)
    i2 = jax.random.normal(jax.random.fold_in(ki, 1), (B2, E), dtype=jnp.float32)
    out2 = jax.block_until_ready(predict_layer(u2, i2, weight, bias))
    ref2 = predict_layer_ref(u2, i2, weight, bias)
    assert out2.shape == (B2, E)
    assert jnp.allclose(out2, ref2, atol=1e-5, rtol=1e-5)

    # --- Test 3: multi-tile grid with ragged tail -----------------------------
    B3 = 200
    u3 = jax.random.normal(jax.random.fold_in(ku, 2), (B3, E), dtype=jnp.float32)
    i3 = jax.random.normal(jax.random.fold_in(ki, 2), (B3, E), dtype=jnp.float32)
    out3 = jax.block_until_ready(predict_layer(u3, i3, weight, bias, block_b=64))
    ref3 = predict_layer_ref(u3, i3, weight, bias)
    assert out3.shape == (B3, E)
    assert jnp.allclose(out3, ref3, atol=1e-5, rtol=1e-5)

    # --- Test 4: bf16 operands cast in-kernel, f32 accumulation ---------------
    out4 = jax.block_until_ready(
        predict_layer(u2, i2, weight, bias, compute_dtype=jnp.bfloat16))
    ref4 = predict_layer_ref(u2.astype(jnp.bfloat16).astype(jnp.float32),
                             i2.astype(jnp.bfloat16).astype(jnp.float32),
                             weight.astype(jnp.bfloat16).astype(jnp.float32),
                             bias)
    assert out4.shape == (B2, E)
    assert jnp.allclose(out4, ref4, atol=5e-2, rtol=5e-2)

    # --- Test 5: bf16 compute + bf16 output -----------------------------------
    out5 = jax.block_until_ready(
        predict_layer(u2, i2, weight, bias,
                      compute_dtype=jnp.bfloat16, out_dtype=jnp.bfloat16))
    assert out5.shape == (B2, E) and out5.dtype == jnp.bfloat16
    assert jnp.allclose(out5.astype(jnp.float32), ref4, atol=5e-2, rtol=5e-2)

    print("KERNEL_OK")
</pallas_src>

<mosaic_0001>
module attributes {stable_mosaic.version = 11 : i64} {
  func.func @_predict_kernel(%arg0: i32, %arg1: memref<8x128xf32, #tpu.memory_space<vmem>>, %arg2: memref<8x128xf32, #tpu.memory_space<vmem>>, %arg3: memref<384x128xf32, #tpu.memory_space<vmem>>, %arg4: memref<1x128xf32, #tpu.memory_space<vmem>>, %arg5: memref<8x128xf32, #tpu.memory_space<vmem>>) attributes {dimension_semantics = [#tpu.dimension_semantics<parallel>], iteration_bounds = array<i64: 1>, scalar_prefetch = 0 : i64, scratch_operands = 0 : i64, tpu.core_type = #tpu.core_type<tc>, window_params = [{transform_indices = @transform_0, window_bounds = array<i64: 8, 128>}, {transform_indices = @transform_1, window_bounds = array<i64: 8, 128>}, {pipeline_mode = #tpu.pipeline_mode<synchronous>, transform_indices = @transform_2, window_bounds = array<i64: 384, 128>}, {pipeline_mode = #tpu.pipeline_mode<synchronous>, transform_indices = @transform_3, window_bounds = array<i64: 1, 128>}, {transform_indices = @transform_4, window_bounds = array<i64: 8, 128>}]} {
    %c0 = arith.constant 0 : index
    %c0_0 = arith.constant 0 : index
    %0 = vector.load %arg1[%c0, %c0_0] : memref<8x128xf32, #tpu.memory_space<vmem>>, vector<8x128xf32>
    %c0_1 = arith.constant 0 : index
    %c0_2 = arith.constant 0 : index
    %1 = vector.load %arg2[%c0_1, %c0_2] : memref<8x128xf32, #tpu.memory_space<vmem>>, vector<8x128xf32>
    %2 = arith.mulf %0, %1 : vector<8x128xf32>
    %c0_3 = arith.constant 0 : index
    %c0_4 = arith.constant 0 : index
    %3 = vector.load %arg3[%c0_3, %c0_4] : memref<384x128xf32, #tpu.memory_space<vmem>>, vector<128x128xf32>
    %cst = arith.constant dense<0.000000e+00> : vector<8x128xf32>
    %4 = tpu.matmul %2, %3, %cst {dimension_numbers = #tpu.dot_dimension_numbers<[1], [0], [0], [1], [0, 0, 1, 1], [], []>} : vector<8x128xf32>, vector<128x128xf32>, vector<8x128xf32> -> vector<8x128xf32>
    %c128 = arith.constant 128 : index
    %c0_5 = arith.constant 0 : index
    %5 = vector.load %arg3[%c128, %c0_5] : memref<384x128xf32, #tpu.memory_space<vmem>>, vector<128x128xf32>
    %cst_6 = arith.constant dense<0.000000e+00> : vector<8x128xf32>
    %6 = tpu.matmul %0, %5, %cst_6 {dimension_numbers = #tpu.dot_dimension_numbers<[1], [0], [0], [1], [0, 0, 1, 1], [], []>} : vector<8x128xf32>, vector<128x128xf32>, vector<8x128xf32> -> vector<8x128xf32>
    %7 = arith.addf %4, %6 : vector<8x128xf32>
    %c256 = arith.constant 256 : index
    %c0_7 = arith.constant 0 : index
    %8 = vector.load %arg3[%c256, %c0_7] : memref<384x128xf32, #tpu.memory_space<vmem>>, vector<128x128xf32>
    %cst_8 = arith.constant dense<0.000000e+00> : vector<8x128xf32>
    %9 = tpu.matmul %1, %8, %cst_8 {dimension_numbers = #tpu.dot_dimension_numbers<[1], [0], [0], [1], [0, 0, 1, 1], [], []>} : vector<8x128xf32>, vector<128x128xf32>, vector<8x128xf32> -> vector<8x128xf32>
    %10 = arith.addf %7, %9 : vector<8x128xf32>
    %c0_9 = arith.constant 0 : index
    %c0_10 = arith.constant 0 : index
    %11 = vector.load %arg4[%c0_9, %c0_10] : memref<1x128xf32, #tpu.memory_space<vmem>>, vector<1x128xf32>
    %12 = vector.broadcast %11 : vector<1x128xf32> to vector<8x128xf32>
    %13 = arith.addf %10, %12 : vector<8x128xf32>
    %cst_11 = arith.constant 0.000000e+00 : f32
    %14 = vector.broadcast %cst_11 : f32 to vector<8x128xf32>
    %15 = arith.maximumf %13, %14 : vector<8x128xf32>
    %c0_12 = arith.constant 0 : index
    %c0_13 = arith.constant 0 : index
    %16 = vector.load %arg5[%c0_12, %c0_13] : memref<8x128xf32, #tpu.memory_space<vmem>>, vector<8x128xf32>
    tpu.vector_store %arg5[%c0_12, %c0_13], %15 {strides = array<i32>} : memref<8x128xf32, #tpu.memory_space<vmem>>, vector<8x128xf32>,
    return
  }
  func.func @transform_0(%arg0: i32) -> (i32, i32) {
    %c0_i32 = arith.constant 0 : i32
    %c0_i32_0 = arith.constant 0 : i32
    return %arg0, %c0_i32 : i32, i32
  }
  func.func @transform_1(%arg0: i32) -> (i32, i32) {
    %c0_i32 = arith.constant 0 : i32
    %c0_i32_0 = arith.constant 0 : i32
    return %arg0, %c0_i32 : i32, i32
  }
  func.func @transform_2(%arg0: i32) -> (i32, i32) {
    %c0_i32 = arith.constant 0 : i32
    %c0_i32_0 = arith.constant 0 : i32
    %c0_i32_1 = arith.constant 0 : i32
    return %c0_i32, %c0_i32_0 : i32, i32
  }
  func.func @transform_3(%arg0: i32) -> (i32, i32) {
    %c0_i32 = arith.constant 0 : i32
    %c0_i32_0 = arith.constant 0 : i32
    %c0_i32_1 = arith.constant 0 : i32
    return %c0_i32, %c0_i32_0 : i32, i32
  }
  func.func @transform_4(%arg0: i32) -> (i32, i32) {
    %c0_i32 = arith.constant 0 : i32
    %c0_i32_0 = arith.constant 0 : i32
    return %arg0, %c0_i32 : i32, i32
  }
}

</mosaic_0001>

<bundles_post_ra>
// kernel: tpu_custom_call.1
= control target key start
LH: loop header
LB: loop body
LE: loop exit
PB: predicated region body
PF: predicated region fallthrough
CT: control target
= control target key end

     0   :  { %9 = vsyncpa [#allocation3], 0  ;;  %s790_s0 = inlined_call_operand.hbm [shape: f32[8,128], index: 0, kind: input, shape index: {}]   ;;  %s791_s1 = inlined_call_operand.hbm [shape: f32[8,128], index: 1, kind: input, shape index: {}]   ;;  %s792_s2 = inlined_call_operand.hbm [shape: f32[384,128], index: 2, kind: input, shape index: {}]   ;;  %s793_s3 = inlined_call_operand.vmem [shape: f32[1,128], index: 3, kind: input, shape index: {}]   ;;  %s794_s4 = inlined_call_operand.hbm [shape: f32[8,128], index: 4, kind: output, shape index: {}]  }
   0x1   :  { %10 = vsyncpa [#allocation6], 0 }
   0x2   :  { %11 = vsyncpa [#allocation4], 0  ;;  %s675_s15 = smov [#allocation5]   ;;  %s676_s17 = smov [#allocation2]  }
   0x3   :  { %s28_s16 = sshll.u32 %s675_s15, 4  ;;  %s18_s18 = sshll.u32 %s676_s17, 4  ;;  %s29_s16 = int_to_ptr.vmem [resolvable:$true] %s28_s16  ;;  %s19_s18 = int_to_ptr.vmem [resolvable:$true] %s18_s18 }
   0x4   :  { %s581_s21 = scalar_lea.hbm %s791_s1, 128 }
   0x5   :  { %p582_p0 = scmp.ne.s32.totalorder %s791_s1, %s581_s21  ;;  %p585_p1 = scmp.lt.u32.totalorder %s581_s21, %s791_s1 }
   0x7   :  { %p587_p2 = pnand %p585_p1, %p582_p0 }
   0x9   :  { %590 = shalt.err (!%p587_p2)
}
   0xa   :  { %s591_s26 = scalar_lea.vmem %s29_s16, 128  ;;  %p596_p4 = scmp.lt.s32.totalorder %s29_s16, %s29_s16 }
   0xb   :  { %p592_p3 = scmp.ne.s32.totalorder %s29_s16, %s591_s26  ;;  %p597_p5 = scmp.lt.s32.totalorder %s591_s26, %s591_s26 }
   0xd   :  { %p598_p6 = por %p597_p5, %p596_p4 }
   0xf   :  { %p599_p7 = pnand %p598_p6, %p592_p3 }
  0x11   :  { %602 = shalt.err (!%p599_p7)
}
  0x12   :  { %31 = dma.hbm_to_vmem [thread:$0]  %s791_s1, 128, %s29_s16, [#allocation6]  }
  0x13   :  { %s603_s5 = scalar_lea.hbm %s790_s0, 128 }
  0x14   :  { %p604_p8 = scmp.ne.s32.totalorder %s790_s0, %s603_s5  ;;  %p607_p9 = scmp.lt.u32.totalorder %s603_s5, %s790_s0 }
  0x16   :  { %p609_p10 = pnand %p607_p9, %p604_p8 }
  0x18   :  { %612 = shalt.err (!%p609_p10)
}
  0x19   :  { %s613_s10 = scalar_lea.vmem %s19_s18, 128  ;;  %p618_p12 = scmp.lt.s32.totalorder %s19_s18, %s19_s18 }
  0x1a   :  { %p614_p11 = scmp.ne.s32.totalorder %s19_s18, %s613_s10  ;;  %p619_p13 = scmp.lt.s32.totalorder %s613_s10, %s613_s10 }
  0x1c   :  { %p620_p0 = por %p619_p13, %p618_p12 }
  0x1e   :  { %p621_p1 = pnand %p620_p0, %p614_p11 }
  0x20   :  { %624 = shalt.err (!%p621_p1)
}
  0x21   :  { %21 = dma.hbm_to_vmem [thread:$0]  %s790_s0, 128, %s19_s18, [#allocation3]  }
  0x22   :  { %s677_s12 = smov [#allocation7]   ;;  %s625_s16 = scalar_lea.hbm %s792_s2, 6144 }
  0x23   :  { %s37_s13 = sshll.u32 %s677_s12, 4  ;;  %p626_p2 = scmp.ne.s32.totalorder %s792_s2, %s625_s16  ;;  %s38_s13 = int_to_ptr.vmem [resolvable:$true] %s37_s13 }
  0x24   :  { %p629_p3 = scmp.lt.u32.totalorder %s625_s16, %s792_s2 }
  0x26   :  { %p631_p4 = pnand %p629_p3, %p626_p2 }
  0x28   :  { %634 = shalt.err (!%p631_p4)
}
  0x29   :  { %s635_s22 = scalar_lea.vmem %s38_s13, 6144  ;;  %p640_p6 = scmp.lt.s32.totalorder %s38_s13, %s38_s13 }
  0x2a   :  { %p636_p5 = scmp.ne.s32.totalorder %s38_s13, %s635_s22  ;;  %p641_p7 = scmp.lt.s32.totalorder %s635_s22, %s635_s22 }
  0x2c   :  { %p642_p8 = por %p641_p7, %p640_p6 }
  0x2e   :  { %p643_p9 = pnand %p642_p8, %p636_p5 }
  0x30   :  { %646 = shalt.err (!%p643_p9)
}
  0x31   :  { %s678_s0 = smov 128   ;;  %s679_s18 = smov 8  }
  0x32   :  { %43 = dma.hbm_to_vmem [thread:$0]  %s792_s2, 6144, %s38_s13, [#allocation6], %s678_s0, %s678_s0, %s679_s18  }
  0x33   :  { %669 = dma.done.wait [#allocation3], 128  }
  0x34   :  { %670 = vsyncadd [#allocation3], 4294967168 }
  0x35   :  { %671 = dma.done.wait [#allocation6], 6272  }
  0x36   :  { %672 = vsyncadd [#allocation6], 4294961024  ;;  %v680_v0 = vmov 0.0|0.0   ;;  %vm681_vm0 = vmmov 0   ;;  %v682_v1 = vmov 0.0   ;;  %v74_v2 = vld [vmem:[#allocation7 + $0x80] sm:$0xff] }
  0x37   :  { %500 = vmatprep.subr.bf16.mxu0 %v680_v0  ;;  %524 = vmatprep.subr.bf16.mxu1 %v680_v0  ;;  %v75_v3 = vld [vmem:[#allocation7 + $0x88] sm:$0xff]  ;;  %v58_v4 = vld [vmem:[#allocation7] sm:$0xff]  ;;  %v76_v7 = vld [vmem:[#allocation7 + $0x90] sm:$0xff]  ;;  %s683_s26 = smov [#allocation8]  }
  0x38   :  { %427 = vmatprep.mubr.msk.f32.mxu0 %vm681_vm0, %v682_v1  ;;  %462 = vmatprep.mubr.msk.f32.mxu1 %vm681_vm0, %v682_v1  ;;  %v501_v5 = vpack.c.bf16 %v75_v3, %v74_v2  ;;  %v59_v6 = vld [vmem:[#allocation7 + $0x8] sm:$0xff]  ;;  %v77_v8 = vld [vmem:[#allocation7 + $0x98] sm:$0xff]  ;;  %v60_v10 = vld [vmem:[#allocation7 + $0x10] sm:$0xff]  ;;  %s333_s27 = sshll.u32 %s683_s26, 4  ;;  %s334_s27 = int_to_ptr.vmem [resolvable:$true] %s333_s27 }
  0x39   :  { %v525_v9 = vpack.c.bf16 %v59_v6, %v58_v4  ;;  %v61_v11 = vld [vmem:[#allocation7 + $0x18] sm:$0xff]  ;;  %v504_v12 = vpack.c.bf16 %v77_v8, %v76_v7  ;;  %v78_v14 = vld [vmem:[#allocation7 + $0xa0] sm:$0xff]  ;;  %v79_v15 = vld [vmem:[#allocation7 + $0xa8] sm:$0xff]  ;;  %s647_s28 = scalar_lea.vmem %s334_s27, 128  ;;  %p652_p11 = scmp.lt.s32.totalorder %s334_s27, %s334_s27 }
  0x3a   :  { %502 = vmatpush3.bf16.msra.mxu0 %v501_v5  ;;  %v528_v13 = vpack.c.bf16 %v61_v11, %v60_v10  ;;  %v62_v16 = vld [vmem:[#allocation7 + $0x20] sm:$0xff]  ;;  %v63_v17 = vld [vmem:[#allocation7 + $0x28] sm:$0xff]  ;;  %v507_v18 = vpack.c.bf16 %v79_v15, %v78_v14  ;;  %v80_v20 = vld [vmem:[#allocation7 + $0xb0] sm:$0xff]  ;;  %p648_p10 = scmp.ne.s32.totalorder %s334_s27, %s647_s28  ;;  %p653_p12 = scmp.lt.s32.totalorder %s647_s28, %s647_s28 }
  0x3b   :  { %526 = vmatpush3.bf16.msra.mxu1 %v525_v9  ;;  %503 = vmatprep.subr.bf16.mxu0 %v680_v0  ;;  %v531_v19 = vpack.c.bf16 %v63_v17, %v62_v16  ;;  %v81_v21 = vld [vmem:[#allocation7 + $0xb8] sm:$0xff]  ;;  %v64_v22 = vld [vmem:[#allocation7 + $0x30] sm:$0xff]  ;;  %v82_v26 = vld [vmem:[#allocation7 + $0xc0] sm:$0xff] }
  0x3c   :  { %527 = vmatprep.subr.bf16.mxu1 %v680_v0  ;;  %v65_v23 = vld [vmem:[#allocation7 + $0x38] sm:$0xff]  ;;  %v510_v24 = vpack.c.bf16 %v81_v21, %v80_v20  ;;  %v83_v27 = vld [vmem:[#allocation7 + $0xc8] sm:$0xff]  ;;  %v66_v28 = vld [vmem:[#allocation7 + $0x40] sm:$0xff]  ;;  %p654_p13 = por %p653_p12, %p652_p11 }
  0x3d   :  { %v534_v25 = vpack.c.bf16 %v65_v23, %v64_v22  ;;  %v67_v29 = vld [vmem:[#allocation7 + $0x48] sm:$0xff]  ;;  %v513_v30 = vpack.c.bf16 %v83_v27, %v82_v26  ;;  %v84_v32 = vld [vmem:[#allocation7 + $0xd0] sm:$0xff]  ;;  %v85_v33 = vld [vmem:[#allocation7 + $0xd8] sm:$0xff] }
  0x3e   :  { %505 = vmatpush3.bf16.msra.mxu0 %v504_v12  ;;  %v537_v31 = vpack.c.bf16 %v67_v29, %v66_v28  ;;  %v68_v34 = vld [vmem:[#allocation7 + $0x50] sm:$0xff]  ;;  %v69_v35 = vld [vmem:[#allocation7 + $0x58] sm:$0xff]  ;;  %v516_v36 = vpack.c.bf16 %v85_v33, %v84_v32  ;;  %v86_v38 = vld [vmem:[#allocation7 + $0xe0] sm:$0xff]  ;;  %p655_p0 = pnand %p654_p13, %p648_p10 }
  0x3f   :  { %529 = vmatpush3.bf16.msra.mxu1 %v528_v13  ;;  %506 = vmatprep.subr.bf16.mxu0 %v680_v0  ;;  %v540_v37 = vpack.c.bf16 %v69_v35, %v68_v34  ;;  %v87_v39 = vld [vmem:[#allocation7 + $0xe8] sm:$0xff]  ;;  %v70_v40 = vld [vmem:[#allocation7 + $0x60] sm:$0xff]  ;;  %v88_v44 = vld [vmem:[#allocation7 + $0xf0] sm:$0xff] }
  0x40   :  { %530 = vmatprep.subr.bf16.mxu1 %v680_v0  ;;  %v71_v41 = vld [vmem:[#allocation7 + $0x68] sm:$0xff]  ;;  %v519_v42 = vpack.c.bf16 %v87_v39, %v86_v38  ;;  %v89_v45 = vld [vmem:[#allocation7 + $0xf8] sm:$0xff]  ;;  %v72_v46 = vld [vmem:[#allocation7 + $0x70] sm:$0xff] }
  0x41   :  { %v543_v43 = vpack.c.bf16 %v71_v41, %v70_v40  ;;  %v73_v47 = vld [vmem:[#allocation7 + $0x78] sm:$0xff]  ;;  %v522_v48 = vpack.c.bf16 %v89_v45, %v88_v44  ;;  %v55_v49 = vld [vmem:[#allocation2] sm:$0xff]  ;;  %v230_v52 = vld [vmem:[#allocation7 + $0x100] sm:$0xff] }
  0x42   :  { %508 = vmatpush3.bf16.msra.mxu0 %v507_v18  ;;  %v546_v50 = vpack.c.bf16 %v73_v47, %v72_v46  ;;  %v56_v51 = vld [vmem:[#allocation5] sm:$0xff]  ;;  %v231_v53 = vld [vmem:[#allocation7 + $0x108] sm:$0xff]  ;;  %v232_v56 = vld [vmem:[#allocation7 + $0x110] sm:$0xff] }
  0x43   :  { %532 = vmatpush3.bf16.msra.mxu1 %v531_v19  ;;  %509 = vmatprep.subr.bf16.mxu0 %v680_v0  ;;  %v57_v54 = vmul.f32 %v56_v51, %v55_v49  ;;  %v549_v55 = vpack.c.bf16 %v231_v53, %v230_v52  ;;  %v233_v57 = vld [vmem:[#allocation7 + $0x118] sm:$0xff]  ;;  %v234_v59 = vld [vmem:[#allocation7 + $0x120] sm:$0xff]  ;;  %v235_v60 = vld [vmem:[#allocation7 + $0x128] sm:$0xff] }
  0x44   :  { %533 = vmatprep.subr.bf16.mxu1 %v680_v0  ;;  %v552_v58 = vpack.c.bf16 %v233_v57, %v232_v56  ;;  %v555_v61 = vpack.c.bf16 %v235_v60, %v234_v59  ;;  %v236_v62 = vld [vmem:[#allocation7 + $0x130] sm:$0xff]  ;;  %v237_v63 = vld [vmem:[#allocation7 + $0x138] sm:$0xff]  ;;  %v238_v3 = vld [vmem:[#allocation7 + $0x140] sm:$0xff] }
  0x45   :  { %v558_v2 = vpack.c.bf16 %v237_v63, %v236_v62  ;;  %v239_v4 = vld [vmem:[#allocation7 + $0x148] sm:$0xff]  ;;  %v240_v6 = vld [vmem:[#allocation7 + $0x150] sm:$0xff]  ;;  %v241_v7 = vld [vmem:[#allocation7 + $0x158] sm:$0xff] }
  0x46   :  { %511 = vmatpush3.bf16.msra.mxu0 %v510_v24  ;;  %v561_v5 = vpack.c.bf16 %v239_v4, %v238_v3  ;;  %v242_v8 = vld [vmem:[#allocation7 + $0x160] sm:$0xff]  ;;  %v243_v9 = vld [vmem:[#allocation7 + $0x168] sm:$0xff]  ;;  %v244_v11 = vld [vmem:[#allocation7 + $0x170] sm:$0xff] }
  0x47   :  { %535 = vmatpush3.bf16.msra.mxu1 %v534_v25  ;;  %512 = vmatprep.subr.bf16.mxu0 %v680_v0  ;;  %v567_v10 = vpack.c.bf16 %v243_v9, %v242_v8  ;;  %v245_v12 = vld [vmem:[#allocation7 + $0x178] sm:$0xff]  ;;  %v343_v20 = vld [vmem:[%s793_s3] ss:$0 sm:$0xff] }
  0x48   :  { %536 = vmatprep.subr.bf16.mxu1 %v680_v0  ;;  %v570_v13 = vpack.c.bf16 %v245_v12, %v244_v11 }
  0x4a   :  { %514 = vmatpush3.bf16.msra.mxu0 %v513_v30 }
  0x4b   :  { %538 = vmatpush3.bf16.msra.mxu1 %v537_v31  ;;  %515 = vmatprep.subr.bf16.mxu0 %v680_v0 }
  0x4c   :  { %539 = vmatprep.subr.bf16.mxu1 %v680_v0 }
  0x4e   :  { %517 = vmatpush3.bf16.msra.mxu0 %v516_v36 }
  0x4f   :  { %541 = vmatpush3.bf16.msra.mxu1 %v540_v37  ;;  %518 = vmatprep.subr.bf16.mxu0 %v680_v0 }
  0x50   :  { %542 = vmatprep.subr.bf16.mxu1 %v680_v0 }
  0x52   :  { %520 = vmatpush3.bf16.msra.mxu0 %v519_v42 }
  0x53   :  { %544 = vmatpush3.bf16.msra.mxu1 %v543_v43  ;;  %521 = vmatprep.subr.bf16.mxu0 %v680_v0 }
  0x54   :  { %545 = vmatprep.subr.bf16.mxu1 %v680_v0 }
  0x56   :  { %523 = vmatpush3.bf16.msra.mxu0 %v522_v48 }
  0x57   :  { %547 = vmatpush3.bf16.msra.mxu1 %v546_v50  ;;  %548 = vmatprep.subr.bf16.mxu0 %v680_v0 }
  0x59   :  { %428 = vmatmul.mubr.f32.vlgmr.msra.gmra.mrb[0].mxu0 %v55_v49 }
  0x5a   :  { %463 = vmatmul.mubr.f32.vlgmr.msra.gmra.mrb[0].mxu1 %v57_v54  ;;  %550 = vmatpush3.bf16.msra.mxu0 %v549_v55 }
  0x5b   :  { %551 = vmatprep.subr.bf16.mxu0 %v680_v0  ;;  %497 = vmatprep.mubr.msk.f32.mxu0 %vm681_vm0, %v682_v1  ;;  %v564_v1 = vpack.c.bf16 %v241_v7, %v240_v6 }
  0x5e   :  { %553 = vmatpush3.bf16.msra.mxu0 %v552_v58 }
  0x5f   :  { %554 = vmatprep.subr.bf16.mxu0 %v680_v0 }
  0x62   :  { %556 = vmatpush3.bf16.msra.mxu0 %v555_v61 }
  0x63   :  { %557 = vmatprep.subr.bf16.mxu0 %v680_v0 }
  0x66   :  { %559 = vmatpush3.bf16.msra.mxu0 %v558_v2 }
  0x67   :  { %560 = vmatprep.subr.bf16.mxu0 %v680_v0 }
  0x6a   :  { %562 = vmatpush3.bf16.msra.mxu0 %v561_v5 }
  0x6b   :  { %563 = vmatprep.subr.bf16.mxu0 %v680_v0 }
  0x6e   :  { %565 = vmatpush3.bf16.msra.mxu0 %v564_v1 }
  0x6f   :  { %566 = vmatprep.subr.bf16.mxu0 %v680_v0 }
  0x72   :  { %568 = vmatpush3.bf16.msra.mxu0 %v567_v10 }
  0x73   :  { %569 = vmatprep.subr.bf16.mxu0 %v680_v0 }
  0x76   :  { %571 = vmatpush3.bf16.msra.mxu0 %v570_v13 }
  0x79   :  { %498 = vmatmul.mubr.f32.vlgmr.msra.gmra.mrb[2].mxu0 %v56_v51 }
 0x12c   :  { %v156_v14 = vpop.f32.mrb[0].mxu0 }
 0x12d   :  { %v429_v15 = vpop.f32.mrb[1].mxu0  ;;  %v226_v16 = vpop.f32.mrb[0].mxu1 }
 0x12e   :  { %v227_v17 = vadd.f32 %v226_v16, %v156_v14  ;;  %v464_v18 = vpop.f32.mrb[1].mxu1 }
 0x14c   :  { %v312_v19 = vpop.f32.mrb[2].mxu0 }
 0x14d   :  { %v316_v21 = vadd.f32 %v312_v19, %v227_v17  ;;  %v499_v22 = vpop.f32.mrb[3].mxu0 }
 0x14f   :  { %v324_v23 = vadd.f32 %v343_v20, %v316_v21 }
 0x151   :  { %v325_v24 = vmax.f32 %v324_v23, 0.0 }
 0x153   :  { %326 = vst [vmem:[#allocation8] sm:$0xff] %v325_v24 }
 0x154   :  { %658 = shalt.err (!%p655_p0)
}
 0x155   :  { %s659_s5 = scalar_lea.hbm %s794_s4, 128 }
 0x156   :  { %p660_p1 = scmp.ne.s32.totalorder %s794_s4, %s659_s5  ;;  %p663_p2 = scmp.lt.u32.totalorder %s659_s5, %s794_s4 }
 0x158   :  { %p665_p3 = pnand %p663_p2, %p660_p1 }
 0x15a   :  { %668 = shalt.err (!%p665_p3)
}
 0x15b   :  { %336 = dma.vmem_to_hbm [thread:$0]  %s334_s27, 128, %s794_s4, [#allocation4]  }
 0x15c   :  { %673 = dma.done.wait [#allocation4], 128  }
 0x15d   :  { %674 = vsyncadd [#allocation4], 4294967168 }
 0x15e   :  { %340 = vsyncpa [#allocation3], 1 }
 0x15f   :  { %341 = vsyncpa [#allocation6], 1 }
 0x160   :  { %342 = vsyncpa [#allocation4], 1 }

</bundles_post_ra>
